<compile_context>
chip_gen: v7x
topology: tpu7x:2x2x1
jax: 0.10.0
libtpu: 0.0.40
codegen_flags: <defaults>
</compile_context>

<pallas_src>
import jax
import jax.numpy as jnp
from jax.experimental import pallas as pl
from jax.experimental.pallas import tpu as pltpu

HEAD_PAD = 128  # lane-dense padded width of the fused (mean || log_var) head


def encoder_kernel(x_ref, w1_ref, b1_ref, wh_ref, bh_ref, out_ref):
    # In-kernel bf16 cast of the activation tile (x arrives from HBM as f32).
    xb = x_ref[...].astype(jnp.bfloat16)

    # fc1: bf16 MXU matmul with f32 accumulation; bias + ReLU epilogue in f32.
    h = jnp.dot(xb, w1_ref[...], preferred_element_type=jnp.float32)
    h = jnp.maximum(h + b1_ref[...], 0.0)

    # Fused heads: one bf16 matmul into a lane-dense (TILE_B, 128) slab.
    # TODO(synk): if higher z_log_var precision is ever needed, keep h in f32
    # here (MXU accepts f32 at reduced rate); bf16 h matches the reference to
    # ~1e-3 for these magnitudes.
    z = jnp.dot(h.astype(wh_ref.dtype), wh_ref[...],
                preferred_element_type=jnp.float32)
    out_ref[...] = (z + bh_ref[...]).astype(out_ref.dtype)


def _round_up(n, m):
    return ((n + m - 1) // m) * m


def _choose_tile_b(B, image_size):
    """Batch tile: >= 4 grid steps when possible (v7x megacore + DMA overlap),
    a multiple of 16 rows, capped so the double-buffered f32 x tile stays
    <= ~16 MiB (total working set well under the 32 MiB scoped VMEM limit)."""
    tile = _round_up(max(pl.cdiv(B, 4), 16), 16)
    cap = 2048
    while cap > 256 and cap * image_size * 4 * 2 > 16 * 1024 * 1024:
        cap //= 2
    return min(cap, tile)


def pack_encoder_params(w1, b1, wm, bm, wv, bv):
    """One-time parameter packing (do at init / checkpoint-load time, NOT per
    forward call): fuse the two heads, zero-pad to 128 lane-dense columns,
    pre-cast weights to bf16 and biases to f32."""
    latent = wm.shape[1]
    assert 2 * latent <= HEAD_PAD, "latent_dim too large for fused 128-wide head"
    wh = jnp.concatenate([wm, wv], axis=1)                   # (inter, 2*latent)
    bh = jnp.concatenate([bm, bv], axis=1)                   # (1, 2*latent)
    wh = jnp.pad(wh, ((0, 0), (0, HEAD_PAD - 2 * latent)))   # zeros in -> zeros out
    bh = jnp.pad(bh, ((0, 0), (0, HEAD_PAD - 2 * latent)))
    return (w1.astype(jnp.bfloat16), b1.astype(jnp.float32),
            wh.astype(jnp.bfloat16), bh.astype(jnp.float32), latent)


def encoder_forward(x, packed):
    """VAE encoder forward.

    x      : (B, image_size) f32
    packed : output of pack_encoder_params
    Returns (z_mean, z_log_var), each (B, latent_dim) f32.
    """
    w1b, b1f, whb, bhf, latent = packed
    B, image_size = x.shape
    inter = w1b.shape[1]

    tile_b = _choose_tile_b(B, image_size)
    Bp = _round_up(B, tile_b)
    xp = x if Bp == B else jnp.pad(x, ((0, Bp - B), (0, 0)))
    grid = (Bp // tile_b,)

    # Advisory cost: f32 x read, bf16 weights, bf16 output slab.
    flops = 2 * Bp * image_size * inter + 2 * Bp * inter * HEAD_PAD
    bytes_accessed = (xp.size * 4 + w1b.size * 2 + whb.size * 2
                      + b1f.size * 4 + bhf.size * 4 + Bp * HEAD_PAD * 2)

    # Weight/bias specs have constant index_map -> fetched once, VMEM-resident.
    # (pipeline_mode=pl.Buffered(1) would shave ~0.4 MiB more if VMEM ever gets
    #  tight on v7x; omitted here since the working set is already small.)
    out = pl.pallas_call(
        encoder_kernel,
        out_shape=jax.ShapeDtypeStruct((Bp, HEAD_PAD), jnp.bfloat16),
        grid=grid,
        in_specs=[
            pl.BlockSpec((tile_b, image_size), lambda i: (i, 0)),  # x tile (pipelined)
            pl.BlockSpec((image_size, inter), lambda i: (0, 0)),   # W1 resident
            pl.BlockSpec((1, inter), lambda i: (0, 0)),            # b1 resident
            pl.BlockSpec((inter, HEAD_PAD), lambda i: (0, 0)),     # W_head resident
            pl.BlockSpec((1, HEAD_PAD), lambda i: (0, 0)),         # b_head resident
        ],
        out_specs=pl.BlockSpec((tile_b, HEAD_PAD), lambda i: (i, 0)),
        compiler_params=pltpu.CompilerParams(
            dimension_semantics=("parallel",),          # megacore on v7x
            vmem_limit_bytes=32 * 1024 * 1024,
        ),
        cost_estimate=pl.CostEstimate(
            flops=flops, transcendentals=0, bytes_accessed=bytes_accessed),
    )(xp, w1b, b1f, whb, bhf)

    # Padded batch rows hold garbage (relu(b1) @ W_head + b_head) -> slice them
    # off here; the zero-padded head columns are exact zeros + bias pad (sliced).
    z = out[:B].astype(jnp.float32)
    return z[:, :latent], z[:, latent:2 * latent]


def init_params(key, image_size, intermediate_dim, latent_dim):
    """Deterministic synthetic parameter init (shapes match nn.Linear, pre-transposed)."""
    ks = jax.random.split(key, 6)
    w1 = jax.random.normal(ks[0], (image_size, intermediate_dim), jnp.float32) * 0.02
    b1 = jax.random.normal(ks[1], (1, intermediate_dim), jnp.float32) * 0.02
    wm = jax.random.normal(ks[2], (intermediate_dim, latent_dim), jnp.float32) * 0.02
    bm = jax.random.normal(ks[3], (1, latent_dim), jnp.float32) * 0.02
    wv = jax.random.normal(ks[4], (intermediate_dim, latent_dim), jnp.float32) * 0.02
    bv = jax.random.normal(ks[5], (1, latent_dim), jnp.float32) * 0.02
    return w1, b1, wm, bm, wv, bv


if __name__ == "__main__":
    # Small shapes consistent with the module: Encoder(image_size=256,
    # intermediate_dim=512, latent_dim=2), batch of 8 flattened images.
    B, image_size, intermediate_dim, latent_dim = 8, 256, 512, 2

    key = jax.random.PRNGKey(0)
    k_x, k_p = jax.random.split(key)
    x = jax.random.normal(k_x, (B, image_size), jnp.float32)
    params = init_params(k_p, image_size, intermediate_dim, latent_dim)

    packed = pack_encoder_params(*params)          # one-time, init-time packing
    z_mean, z_log_var = encoder_forward(x, packed)
    jax.block_until_ready((z_mean, z_log_var))

    # Pure-JAX f32 reference (kernel uses bf16 matmuls / bf16 slab -> loose tol)
    w1, b1, wm, bm, wv, bv = params
    h_ref = jnp.maximum(x @ w1 + b1, 0.0)
    zm_ref = h_ref @ wm + bm
    zv_ref = h_ref @ wv + bv
    assert z_mean.shape == (B, latent_dim) and z_log_var.shape == (B, latent_dim)
    assert jnp.allclose(z_mean, zm_ref, atol=2e-2, rtol=2e-2), \
        f"z_mean mismatch: {jnp.max(jnp.abs(z_mean - zm_ref))}"
    assert jnp.allclose(z_log_var, zv_ref, atol=2e-2, rtol=2e-2), \
        f"z_log_var mismatch: {jnp.max(jnp.abs(z_log_var - zv_ref))}"

    print("KERNEL_OK")
</pallas_src>

<mosaic_0001>
module attributes {stable_mosaic.version = 11 : i64} {
  func.func @encoder_kernel(%arg0: i32, %arg1: memref<16x256xf32, #tpu.memory_space<vmem>>, %arg2: memref<256x512xbf16, #tpu.memory_space<vmem>>, %arg3: memref<1x512xf32, #tpu.memory_space<vmem>>, %arg4: memref<512x128xbf16, #tpu.memory_space<vmem>>, %arg5: memref<1x128xf32, #tpu.memory_space<vmem>>, %arg6: memref<16x128xbf16, #tpu.memory_space<vmem>>) attributes {dimension_semantics = [#tpu.dimension_semantics<parallel>], iteration_bounds = array<i64: 1>, scalar_prefetch = 0 : i64, scratch_operands = 0 : i64, tpu.core_type = #tpu.core_type<tc>, window_params = [{transform_indices = @transform_0, window_bounds = array<i64: 16, 256>}, {pipeline_mode = #tpu.pipeline_mode<synchronous>, transform_indices = @transform_1, window_bounds = array<i64: 256, 512>}, {pipeline_mode = #tpu.pipeline_mode<synchronous>, transform_indices = @transform_2, window_bounds = array<i64: 1, 512>}, {pipeline_mode = #tpu.pipeline_mode<synchronous>, transform_indices = @transform_3, window_bounds = array<i64: 512, 128>}, {pipeline_mode = #tpu.pipeline_mode<synchronous>, transform_indices = @transform_4, window_bounds = array<i64: 1, 128>}, {transform_indices = @transform_5, window_bounds = array<i64: 16, 128>}]} {
    %c0 = arith.constant 0 : index
    %c0_0 = arith.constant 0 : index
    %0 = vector.load %arg1[%c0, %c0_0] : memref<16x256xf32, #tpu.memory_space<vmem>>, vector<16x256xf32>
    %1 = arith.truncf %0 : vector<16x256xf32> to vector<16x256xbf16>
    %c0_1 = arith.constant 0 : index
    %c0_2 = arith.constant 0 : index
    %2 = vector.load %arg2[%c0_1, %c0_2] : memref<256x512xbf16, #tpu.memory_space<vmem>>, vector<256x512xbf16>
    %cst = arith.constant dense<0.000000e+00> : vector<16x512xf32>
    %3 = tpu.matmul %1, %2, %cst {dimension_numbers = #tpu.dot_dimension_numbers<[1], [0], [0], [1], [0, 0, 1, 1], [], []>} : vector<16x256xbf16>, vector<256x512xbf16>, vector<16x512xf32> -> vector<16x512xf32>
    %c0_3 = arith.constant 0 : index
    %c0_4 = arith.constant 0 : index
    %4 = vector.load %arg3[%c0_3, %c0_4] : memref<1x512xf32, #tpu.memory_space<vmem>>, vector<1x512xf32>
    %5 = vector.broadcast %4 : vector<1x512xf32> to vector<16x512xf32>
    %6 = arith.addf %3, %5 : vector<16x512xf32>
    %cst_5 = arith.constant 0.000000e+00 : f32
    %7 = vector.broadcast %cst_5 : f32 to vector<16x512xf32>
    %8 = arith.maximumf %6, %7 : vector<16x512xf32>
    %9 = arith.truncf %8 : vector<16x512xf32> to vector<16x512xbf16>
    %c0_6 = arith.constant 0 : index
    %c0_7 = arith.constant 0 : index
    %10 = vector.load %arg4[%c0_6, %c0_7] : memref<512x128xbf16, #tpu.memory_space<vmem>>, vector<512x128xbf16>
    %cst_8 = arith.constant dense<0.000000e+00> : vector<16x128xf32>
    %11 = tpu.matmul %9, %10, %cst_8 {dimension_numbers = #tpu.dot_dimension_numbers<[1], [0], [0], [1], [0, 0, 1, 1], [], []>} : vector<16x512xbf16>, vector<512x128xbf16>, vector<16x128xf32> -> vector<16x128xf32>
    %c0_9 = arith.constant 0 : index
    %c0_10 = arith.constant 0 : index
    %12 = vector.load %arg5[%c0_9, %c0_10] : memref<1x128xf32, #tpu.memory_space<vmem>>, vector<1x128xf32>
    %13 = vector.broadcast %12 : vector<1x128xf32> to vector<16x128xf32>
    %14 = arith.addf %11, %13 : vector<16x128xf32>
    %15 = arith.truncf %14 : vector<16x128xf32> to vector<16x128xbf16>
    %c0_11 = arith.constant 0 : index
    %c0_12 = arith.constant 0 : index
    %16 = vector.load %arg6[%c0_11, %c0_12] : memref<16x128xbf16, #tpu.memory_space<vmem>>, vector<16x128xbf16>
    tpu.vector_store %arg6[%c0_11, %c0_12], %15 {strides = array<i32>} : memref<16x128xbf16, #tpu.memory_space<vmem>>, vector<16x128xbf16>,
    return
  }
  func.func @transform_0(%arg0: i32) -> (i32, i32) {
    %c0_i32 = arith.constant 0 : i32
    %c0_i32_0 = arith.constant 0 : i32
    return %arg0, %c0_i32 : i32, i32
  }
  func.func @transform_1(%arg0: i32) -> (i32, i32) {
    %c0_i32 = arith.constant 0 : i32
    %c0_i32_0 = arith.constant 0 : i32
    %c0_i32_1 = arith.constant 0 : i32
    return %c0_i32, %c0_i32_0 : i32, i32
  }
  func.func @transform_2(%arg0: i32) -> (i32, i32) {
    %c0_i32 = arith.constant 0 : i32
    %c0_i32_0 = arith.constant 0 : i32
    %c0_i32_1 = arith.constant 0 : i32
    return %c0_i32, %c0_i32_0 : i32, i32
  }
  func.func @transform_3(%arg0: i32) -> (i32, i32) {
    %c0_i32 = arith.constant 0 : i32
    %c0_i32_0 = arith.constant 0 : i32
    %c0_i32_1 = arith.constant 0 : i32
    return %c0_i32, %c0_i32_0 : i32, i32
  }
  func.func @transform_4(%arg0: i32) -> (i32, i32) {
    %c0_i32 = arith.constant 0 : i32
    %c0_i32_0 = arith.constant 0 : i32
    %c0_i32_1 = arith.constant 0 : i32
    return %c0_i32, %c0_i32_0 : i32, i32
  }
  func.func @transform_5(%arg0: i32) -> (i32, i32) {
    %c0_i32 = arith.constant 0 : i32
    %c0_i32_0 = arith.constant 0 : i32
    return %arg0, %c0_i32 : i32, i32
  }
}

</mosaic_0001>

<bundles_post_ra>
// kernel: tpu_custom_call.1
= control target key start
LH: loop header
LB: loop body
LE: loop exit
PB: predicated region body
PF: predicated region fallthrough
CT: control target
= control target key end

     0   :  { %10 = vsyncpa [#allocation3], 0  ;;  %s1431_s0 = inlined_call_operand.hbm [shape: f32[16,256], index: 0, kind: input, shape index: {}]   ;;  %s1432_s1 = inlined_call_operand.hbm [shape: bf16[256,512], index: 1, kind: input, shape index: {}]   ;;  %s1433_s2 = inlined_call_operand.vmem [shape: f32[1,512], index: 2, kind: input, shape index: {}]   ;;  %s1434_s3 = inlined_call_operand.hbm [shape: bf16[512,128], index: 3, kind: input, shape index: {}]   ;;  %s1435_s4 = inlined_call_operand.vmem [shape: f32[1,128], index: 4, kind: input, shape index: {}]   ;;  %s1436_s5 = inlined_call_operand.hbm [shape: bf16[16,128], index: 5, kind: output, shape index: {}]  }
   0x1   :  { %11 = vsyncpa [#allocation6], 0 }
   0x2   :  { %12 = vsyncpa [#allocation4], 0  ;;  %s1326_s18 = smov [#allocation5]   ;;  %s1327_s20 = smov [#allocation2]  }
   0x3   :  { %s30_s19 = sshll.u32 %s1326_s18, 4  ;;  %s18_s21 = sshll.u32 %s1327_s20, 4  ;;  %s31_s19 = int_to_ptr.vmem [resolvable:$true] %s30_s19  ;;  %s1364_s21 = int_to_ptr.vmem [resolvable:$true] %s18_s21 }
   0x4   :  { %s1232_s24 = scalar_lea.hbm %s1432_s1, 8192 }
   0x5   :  { %p1233_p0 = scmp.ne.s32.totalorder %s1432_s1, %s1232_s24  ;;  %p1236_p1 = scmp.lt.u32.totalorder %s1232_s24, %s1432_s1 }
   0x7   :  { %p1238_p2 = pnand %p1236_p1, %p1233_p0 }
   0x9   :  { %1241 = shalt.err (!%p1238_p2)
}
   0xa   :  { %s1242_s29 = scalar_lea.vmem %s31_s19, 8192  ;;  %p1247_p4 = scmp.lt.s32.totalorder %s31_s19, %s31_s19 }
   0xb   :  { %p1243_p3 = scmp.ne.s32.totalorder %s31_s19, %s1242_s29  ;;  %p1248_p5 = scmp.lt.s32.totalorder %s1242_s29, %s1242_s29 }
   0xd   :  { %p1249_p6 = por %p1248_p5, %p1247_p4 }
   0xf   :  { %p1250_p7 = pnand %p1249_p6, %p1243_p3 }
  0x11   :  { %1253 = shalt.err (!%p1250_p7)
}
  0x12   :  { %s1328_s30 = smov 256   ;;  %s1329_s6 = smov 16  }
  0x13   :  { %36 = dma.hbm_to_vmem [thread:$0]  %s1432_s1, 8192, %s31_s19, [#allocation6], %s1328_s30, %s1328_s30, %s1329_s6  }
  0x14   :  { %s1254_s11 = scalar_lea.hbm %s1431_s0, 512 }
  0x15   :  { %p1255_p8 = scmp.ne.s32.totalorder %s1431_s0, %s1254_s11  ;;  %p1258_p9 = scmp.lt.u32.totalorder %s1254_s11, %s1431_s0 }
  0x17   :  { %p1260_p10 = pnand %p1258_p9, %p1255_p8 }
  0x19   :  { %1263 = shalt.err (!%p1260_p10)
}
  0x1a   :  { %s1264_s16 = scalar_lea.vmem %s1364_s21, 512  ;;  %p1269_p12 = scmp.lt.s32.totalorder %s1364_s21, %s1364_s21 }
  0x1b   :  { %p1265_p11 = scmp.ne.s32.totalorder %s1364_s21, %s1264_s16  ;;  %p1270_p13 = scmp.lt.s32.totalorder %s1264_s16, %s1264_s16 }
  0x1d   :  { %p1271_p0 = por %p1270_p13, %p1269_p12 }
  0x1f   :  { %p1272_p1 = pnand %p1271_p0, %p1265_p11 }
  0x21   :  { %1275 = shalt.err (!%p1272_p1)
}
  0x22   :  { %24 = dma.hbm_to_vmem [thread:$0]  %s1431_s0, 512, %s1364_s21, [#allocation3], %s1328_s30, %s1328_s30, %s1329_s6  }
  0x23   :  { %s1330_s18 = smov [#allocation7]   ;;  %s1276_s23 = scalar_lea.hbm %s1434_s3, 4096 }
  0x24   :  { %s44_s19 = sshll.u32 %s1330_s18, 4  ;;  %p1277_p2 = scmp.ne.s32.totalorder %s1434_s3, %s1276_s23  ;;  %s45_s19 = int_to_ptr.vmem [resolvable:$true] %s44_s19 }
  0x25   :  { %p1280_p3 = scmp.lt.u32.totalorder %s1276_s23, %s1434_s3 }
  0x27   :  { %p1282_p4 = pnand %p1280_p3, %p1277_p2 }
  0x29   :  { %1285 = shalt.err (!%p1282_p4)
}
  0x2a   :  { %s1286_s28 = scalar_lea.vmem %s45_s19, 4096  ;;  %p1291_p6 = scmp.lt.s32.totalorder %s45_s19, %s45_s19 }
  0x2b   :  { %p1287_p5 = scmp.ne.s32.totalorder %s45_s19, %s1286_s28  ;;  %p1292_p7 = scmp.lt.s32.totalorder %s1286_s28, %s1286_s28 }
  0x2d   :  { %p1293_p8 = por %p1292_p7, %p1291_p6 }
  0x2f   :  { %p1294_p9 = pnand %p1293_p8, %p1287_p5 }
  0x31   :  { %1297 = shalt.err (!%p1294_p9)
}
  0x32   :  { %s1331_s0 = smov 64   ;;  %s1332_s21 = smov 4  }
  0x33   :  { %50 = dma.hbm_to_vmem [thread:$0]  %s1434_s3, 4096, %s45_s19, [#allocation6], %s1331_s0, %s1331_s0, %s1332_s21  }
  0x34   :  { %1320 = dma.done.wait [#allocation3], 512  }
  0x35   :  { %1321 = vsyncadd [#allocation3], 4294966784 }
  0x36   :  { %1322 = dma.done.wait [#allocation6], 12288  }
  0x37   :  { %1323 = vsyncadd [#allocation6], 4294955008  ;;  %v1104_v0 = vld [vmem:[#allocation5 + $0x4] ss:$16 sps:$4 sm:$0xff]   ;;  %v1106_v1 = vld [vmem:[#allocation5 + $0xc] ss:$16 sps:$4 sm:$0xff]  }
  0x38   :  { %475 = vmatprep.subr.bf16.mxu0 %v1104_v0  ;;  %v1108_v2 = vld [vmem:[#allocation5] ss:$16 sps:$4 sm:$0xff]   ;;  %v1109_v3 = vld [vmem:[#allocation5 + $0x8] ss:$16 sps:$4 sm:$0xff]   ;;  %518 = vmatprep.subr.bf16.mxu1 %v1106_v1  ;;  %v1110_v4 = vld [vmem:[#allocation5 + $0x24] ss:$16 sps:$4 sm:$0xff]  }
  0x39   :  { %476 = vmatpush1.bf16.msra.mxu0 %v1108_v2  ;;  %519 = vmatpush1.bf16.msra.mxu1 %v1109_v3  ;;  %v1112_v5 = vld [vmem:[#allocation5 + $0x2c] ss:$16 sps:$4 sm:$0xff]   ;;  %v1114_v6 = vld [vmem:[#allocation5 + $0x20] ss:$16 sps:$4 sm:$0xff]   ;;  %v1115_v7 = vld [vmem:[#allocation5 + $0x28] ss:$16 sps:$4 sm:$0xff]  }
  0x3a   :  { %477 = vmatprep.subr.bf16.mxu0 %v1110_v4  ;;  %520 = vmatprep.subr.bf16.mxu1 %v1112_v5  ;;  %v1116_v8 = vld [vmem:[#allocation5 + $0x44] ss:$16 sps:$4 sm:$0xff]   ;;  %v1118_v9 = vld [vmem:[#allocation5 + $0x4c] ss:$16 sps:$4 sm:$0xff]   ;;  %v1120_v10 = vld [vmem:[#allocation5 + $0x40] ss:$16 sps:$4 sm:$0xff]  }
  0x3b   :  { %v1121_v11 = vld [vmem:[#allocation5 + $0x48] ss:$16 sps:$4 sm:$0xff]   ;;  %v1122_v12 = vld [vmem:[#allocation5 + $0x64] ss:$16 sps:$4 sm:$0xff]   ;;  %v1124_v13 = vld [vmem:[#allocation5 + $0x6c] ss:$16 sps:$4 sm:$0xff]  }
  0x3c   :  { %v1126_v14 = vld [vmem:[#allocation5 + $0x60] ss:$16 sps:$4 sm:$0xff]   ;;  %v1127_v15 = vld [vmem:[#allocation5 + $0x68] ss:$16 sps:$4 sm:$0xff]   ;;  %v1128_v16 = vld [vmem:[#allocation5 + $0x84] ss:$16 sps:$4 sm:$0xff]  }
  0x3d   :  { %478 = vmatpush1.bf16.msra.mxu0 %v1114_v6  ;;  %521 = vmatpush1.bf16.msra.mxu1 %v1115_v7  ;;  %v1130_v17 = vld [vmem:[#allocation5 + $0x8c] ss:$16 sps:$4 sm:$0xff]   ;;  %v1132_v18 = vld [vmem:[#allocation5 + $0x80] ss:$16 sps:$4 sm:$0xff]   ;;  %v1133_v19 = vld [vmem:[#allocation5 + $0x88] ss:$16 sps:$4 sm:$0xff]  }
  0x3e   :  { %479 = vmatprep.subr.bf16.mxu0 %v1116_v8  ;;  %522 = vmatprep.subr.bf16.mxu1 %v1118_v9  ;;  %v1134_v20 = vld [vmem:[#allocation5 + $0xa4] ss:$16 sps:$4 sm:$0xff]   ;;  %v1136_v21 = vld [vmem:[#allocation5 + $0xac] ss:$16 sps:$4 sm:$0xff]   ;;  %v1138_v22 = vld [vmem:[#allocation5 + $0xa0] ss:$16 sps:$4 sm:$0xff]  }
  0x3f   :  { %v1139_v23 = vld [vmem:[#allocation5 + $0xa8] ss:$16 sps:$4 sm:$0xff]   ;;  %v1140_v24 = vld [vmem:[#allocation5 + $0xc4] ss:$16 sps:$4 sm:$0xff]   ;;  %v1142_v25 = vld [vmem:[#allocation5 + $0xcc] ss:$16 sps:$4 sm:$0xff]  }
  0x40   :  { %v1144_v26 = vld [vmem:[#allocation5 + $0xc0] ss:$16 sps:$4 sm:$0xff]   ;;  %v1145_v27 = vld [vmem:[#allocation5 + $0xc8] ss:$16 sps:$4 sm:$0xff]   ;;  %v1146_v28 = vld [vmem:[#allocation5 + $0xe4] ss:$16 sps:$4 sm:$0xff]  }
  0x41   :  { %480 = vmatpush1.bf16.msra.mxu0 %v1120_v10  ;;  %523 = vmatpush1.bf16.msra.mxu1 %v1121_v11  ;;  %v1148_v29 = vld [vmem:[#allocation5 + $0xec] ss:$16 sps:$4 sm:$0xff]   ;;  %v1150_v30 = vld [vmem:[#allocation5 + $0xe0] ss:$16 sps:$4 sm:$0xff]   ;;  %v1151_v31 = vld [vmem:[#allocation5 + $0xe8] ss:$16 sps:$4 sm:$0xff]  }
  0x42   :  { %481 = vmatprep.subr.bf16.mxu0 %v1122_v12  ;;  %524 = vmatprep.subr.bf16.mxu1 %v1124_v13  ;;  %v1152_v32 = vld [vmem:[#allocation5 + $0x104] ss:$16 sps:$4 sm:$0xff]   ;;  %v1154_v33 = vld [vmem:[#allocation5 + $0x10c] ss:$16 sps:$4 sm:$0xff]   ;;  %v1156_v34 = vld [vmem:[#allocation5 + $0x100] ss:$16 sps:$4 sm:$0xff]  }
  0x43   :  { %v1157_v35 = vld [vmem:[#allocation5 + $0x108] ss:$16 sps:$4 sm:$0xff]   ;;  %v1158_v36 = vld [vmem:[#allocation5 + $0x124] ss:$16 sps:$4 sm:$0xff]   ;;  %v1160_v37 = vld [vmem:[#allocation5 + $0x12c] ss:$16 sps:$4 sm:$0xff]  }
  0x44   :  { %v1162_v38 = vld [vmem:[#allocation5 + $0x120] ss:$16 sps:$4 sm:$0xff]   ;;  %v1163_v39 = vld [vmem:[#allocation5 + $0x128] ss:$16 sps:$4 sm:$0xff]   ;;  %v1164_v40 = vld [vmem:[#allocation5 + $0x144] ss:$16 sps:$4 sm:$0xff]  }
  0x45   :  { %482 = vmatpush1.bf16.msra.mxu0 %v1126_v14  ;;  %525 = vmatpush1.bf16.msra.mxu1 %v1127_v15  ;;  %v1166_v41 = vld [vmem:[#allocation5 + $0x14c] ss:$16 sps:$4 sm:$0xff]   ;;  %v1168_v42 = vld [vmem:[#allocation5 + $0x140] ss:$16 sps:$4 sm:$0xff]   ;;  %v1169_v43 = vld [vmem:[#allocation5 + $0x148] ss:$16 sps:$4 sm:$0xff]  }
  0x46   :  { %483 = vmatprep.subr.bf16.mxu0 %v1128_v16  ;;  %526 = vmatprep.subr.bf16.mxu1 %v1130_v17  ;;  %v1170_v44 = vld [vmem:[#allocation5 + $0x164] ss:$16 sps:$4 sm:$0xff]   ;;  %v1172_v45 = vld [vmem:[#allocation5 + $0x16c] ss:$16 sps:$4 sm:$0xff]   ;;  %v1174_v47 = vld [vmem:[#allocation5 + $0x160] ss:$16 sps:$4 sm:$0xff]  }
  0x47   :  { %v64_v46 = vld [vmem:[#allocation2 + $0x8] sm:$0xff]  ;;  %v66_v49 = vld [vmem:[#allocation2 + $0x18] sm:$0xff]  ;;  %v1176_v50 = vld [vmem:[#allocation5 + $0x184] ss:$16 sps:$4 sm:$0xff]   ;;  %s1333_s8 = smov [#allocation8]  }
  0x48   :  { %v1175_v48 = vld [vmem:[#allocation5 + $0x168] ss:$16 sps:$4 sm:$0xff]   ;;  %v68_v51 = vpack.c.bf16 %v66_v49, %v64_v46  ;;  %v1178_v52 = vld [vmem:[#allocation5 + $0x18c] ss:$16 sps:$4 sm:$0xff]   ;;  %v1180_v53 = vld [vmem:[#allocation5 + $0x180] ss:$16 sps:$4 sm:$0xff]  }
  0x49   :  { %484 = vmatpush1.bf16.msra.mxu0 %v1132_v18  ;;  %527 = vmatpush1.bf16.msra.mxu1 %v1133_v19  ;;  %v1181_v54 = vld [vmem:[#allocation5 + $0x188] ss:$16 sps:$4 sm:$0xff]   ;;  %v1182_v55 = vld [vmem:[#allocation5 + $0x1a4] ss:$16 sps:$4 sm:$0xff]   ;;  %v1184_v56 = vld [vmem:[#allocation5 + $0x1ac] ss:$16 sps:$4 sm:$0xff]  }
  0x4a   :  { %485 = vmatprep.subr.bf16.mxu0 %v1134_v20  ;;  %528 = vmatprep.subr.bf16.mxu1 %v1136_v21  ;;  %v1186_v57 = vld [vmem:[#allocation5 + $0x1a0] ss:$16 sps:$4 sm:$0xff]   ;;  %v1187_v58 = vld [vmem:[#allocation5 + $0x1a8] ss:$16 sps:$4 sm:$0xff]   ;;  %v1188_v59 = vld [vmem:[#allocation5 + $0x1c4] ss:$16 sps:$4 sm:$0xff]  }
  0x4b   :  { %507 = vmatprep.mubr.bf16.mxu0 %v68_v51  ;;  %550 = vmatprep.mubr.bf16.mxu1 %v68_v51  ;;  %v1190_v60 = vld [vmem:[#allocation5 + $0x1cc] ss:$16 sps:$4 sm:$0xff]   ;;  %v1192_v61 = vld [vmem:[#allocation5 + $0x1c0] ss:$16 sps:$4 sm:$0xff]   ;;  %v1193_v62 = vld [vmem:[#allocation5 + $0x1c8] ss:$16 sps:$4 sm:$0xff]  }
  0x4c   :  { %v1194_v63 = vld [vmem:[#allocation5 + $0x1e4] ss:$16 sps:$4 sm:$0xff]   ;;  %v1196_v0 = vld [vmem:[#allocation5 + $0x1ec] ss:$16 sps:$4 sm:$0xff]   ;;  %v1198_v1 = vld [vmem:[#allocation5 + $0x1e0] ss:$16 sps:$4 sm:$0xff]  }
  0x4d   :  { %486 = vmatpush1.bf16.msra.mxu0 %v1138_v22  ;;  %529 = vmatpush1.bf16.msra.mxu1 %v1139_v23  ;;  %v1199_v2 = vld [vmem:[#allocation5 + $0x1e8] ss:$16 sps:$4 sm:$0xff]   ;;  %v63_v3 = vld [vmem:[#allocation2] sm:$0xff]  ;;  %v65_v4 = vld [vmem:[#allocation2 + $0x10] sm:$0xff]  ;;  %s933_s9 = sshll.u32 %s1333_s8, 4  ;;  %s934_s9 = int_to_ptr.vmem [resolvable:$true] %s933_s9 }
  0x4e   :  { %487 = vmatprep.subr.bf16.mxu0 %v1140_v24  ;;  %530 = vmatprep.subr.bf16.mxu1 %v1142_v25  ;;  %v1200_v5 = vld [vmem:[#allocation7 + $0x40] sm:$0xff]   ;;  %v67_v8 = vpack.c.bf16 %v65_v4, %v63_v3  ;;  %v1204_v10 = vld [vmem:[#allocation7 + $0x48] sm:$0xff]   ;;  %v1208_v14 = vld [vmem:[#allocation7 + $0x50] sm:$0xff]   ;;  %p1303_p11 = scmp.lt.s32.totalorder %s934_s9, %s934_s9 }
  0x4f   :  { %v1201_v6 = vld [vmem:[#allocation7 + $0xc0] sm:$0xff]   ;;  %v1205_v11 = vld [vmem:[#allocation7 + $0xc8] sm:$0xff]   ;;  %v1209_v15 = vld [vmem:[#allocation7 + $0xd0] sm:$0xff]  }
  0x50   :  { %v1202_v7 = vld [vmem:[#allocation7] sm:$0xff]   ;;  %v1206_v12 = vld [vmem:[#allocation7 + $0x8] sm:$0xff]   ;;  %v1210_v16 = vld [vmem:[#allocation7 + $0x10] sm:$0xff]  }
  0x51   :  { %488 = vmatpush1.bf16.msra.mxu0 %v1144_v26  ;;  %531 = vmatpush1.bf16.msra.mxu1 %v1145_v27  ;;  %v1203_v9 = vld [vmem:[#allocation7 + $0x80] sm:$0xff]   ;;  %v1207_v13 = vld [vmem:[#allocation7 + $0x88] sm:$0xff]   ;;  %v1211_v17 = vld [vmem:[#allocation7 + $0x90] sm:$0xff]  }
  0x52   :  { %489 = vmatprep.subr.bf16.mxu0 %v1146_v28  ;;  %532 = vmatprep.subr.bf16.mxu1 %v1148_v29  ;;  %v1212_v18 = vld [vmem:[#allocation7 + $0x58] sm:$0xff]   ;;  %v1216_v22 = vld [vmem:[#allocation7 + $0x60] sm:$0xff]   ;;  %v1220_v26 = vld [vmem:[#allocation7 + $0x68] sm:$0xff]  }
  0x53   :  { %v1213_v19 = vld [vmem:[#allocation7 + $0xd8] sm:$0xff]   ;;  %v1217_v23 = vld [vmem:[#allocation7 + $0xe0] sm:$0xff]   ;;  %v1221_v27 = vld [vmem:[#allocation7 + $0xe8] sm:$0xff]  }
  0x54   :  { %v1214_v20 = vld [vmem:[#allocation7 + $0x18] sm:$0xff]   ;;  %v1218_v24 = vld [vmem:[#allocation7 + $0x20] sm:$0xff]   ;;  %v1222_v28 = vld [vmem:[#allocation7 + $0x28] sm:$0xff]  }
  0x55   :  { %490 = vmatpush1.bf16.msra.mxu0 %v1150_v30  ;;  %533 = vmatpush1.bf16.msra.mxu1 %v1151_v31  ;;  %v1215_v21 = vld [vmem:[#allocation7 + $0x98] sm:$0xff]   ;;  %v1219_v25 = vld [vmem:[#allocation7 + $0xa0] sm:$0xff]   ;;  %v1223_v29 = vld [vmem:[#allocation7 + $0xa8] sm:$0xff]  }
  0x56   :  { %491 = vmatprep.subr.bf16.mxu0 %v1152_v32  ;;  %534 = vmatprep.subr.bf16.mxu1 %v1154_v33  ;;  %v1224_v30 = vld [vmem:[#allocation7 + $0x70] sm:$0xff]  }
  0x57   :  { %v1225_v31 = vld [vmem:[#allocation7 + $0xf0] sm:$0xff]  }
  0x58   :  { %v1226_v32 = vld [vmem:[#allocation7 + $0x30] sm:$0xff]  }
  0x59   :  { %492 = vmatpush1.bf16.msra.mxu0 %v1156_v34  ;;  %535 = vmatpush1.bf16.msra.mxu1 %v1157_v35  ;;  %v1227_v33 = vld [vmem:[#allocation7 + $0xb0] sm:$0xff]   ;;  %v1228_v34 = vld [vmem:[#allocation7 + $0x78] sm:$0xff]  }
  0x5a   :  { %493 = vmatprep.subr.bf16.mxu0 %v1158_v36  ;;  %536 = vmatprep.subr.bf16.mxu1 %v1160_v37  ;;  %v1229_v35 = vld [vmem:[#allocation7 + $0xf8] sm:$0xff]  }
  0x5b   :  { %v1230_v36 = vld [vmem:[#allocation7 + $0x38] sm:$0xff]  }
  0x5c   :  { %v1231_v37 = vld [vmem:[#allocation7 + $0xb8] sm:$0xff]  }
  0x5d   :  { %494 = vmatpush1.bf16.msra.mxu0 %v1162_v38  ;;  %537 = vmatpush1.bf16.msra.mxu1 %v1163_v39  ;;  %v135_v38 = vlaneseq }
  0x5e   :  { %495 = vmatprep.subr.bf16.mxu0 %v1164_v40  ;;  %538 = vmatprep.subr.bf16.mxu1 %v1166_v41 }
  0x5f   :  { %v136_v39 = vshrl.u32 %v135_v38, 7 }
  0x61   :  { %496 = vmatpush1.bf16.msra.mxu0 %v1168_v42  ;;  %539 = vmatpush1.bf16.msra.mxu1 %v1169_v43  ;;  %v137_v40 = vsub.s32 0, %v136_v39  ;;  %v145_v41 = vsub.s32 2, %v136_v39  ;;  %v133_v42 = vld [vmem:[%s1433_s2] sm:$0xf]  ;;  %v141_v43 = vsub.s32 1, %v136_v39 }
  0x62   :  { %497 = vmatprep.subr.bf16.mxu0 %v1170_v44  ;;  %540 = vmatprep.subr.bf16.mxu1 %v1172_v45  ;;  %v149_v44 = vsub.s32 3, %v136_v39 }
  0x63   :  { %v138_v45 = vrot.slane %v133_v42, %v137_v40  ;;  %v146_v46 = vrot.slane %v133_v42, %v145_v41 }
  0x65   :  { %498 = vmatpush1.bf16.msra.mxu0 %v1174_v47  ;;  %541 = vmatpush1.bf16.msra.mxu1 %v1175_v48  ;;  %v142_v47 = vrot.slane %v133_v42, %v141_v43  ;;  %v150_v48 = vrot.slane %v133_v42, %v149_v44 }
  0x66   :  { %499 = vmatprep.subr.bf16.mxu0 %v1176_v50  ;;  %542 = vmatprep.subr.bf16.mxu1 %v1178_v52 }
  0x69   :  { %500 = vmatpush1.bf16.msra.mxu0 %v1180_v53  ;;  %543 = vmatpush1.bf16.msra.mxu1 %v1181_v54 }
  0x6a   :  { %501 = vmatprep.subr.bf16.mxu0 %v1182_v55  ;;  %544 = vmatprep.subr.bf16.mxu1 %v1184_v56 }
  0x6d   :  { %502 = vmatpush1.bf16.msra.mxu0 %v1186_v57  ;;  %545 = vmatpush1.bf16.msra.mxu1 %v1187_v58 }
  0x6e   :  { %503 = vmatprep.subr.bf16.mxu0 %v1188_v59  ;;  %546 = vmatprep.subr.bf16.mxu1 %v1190_v60 }
  0x71   :  { %504 = vmatpush1.bf16.msra.mxu0 %v1192_v61  ;;  %547 = vmatpush1.bf16.msra.mxu1 %v1193_v62 }
  0x72   :  { %505 = vmatprep.subr.bf16.mxu0 %v1194_v63  ;;  %548 = vmatprep.subr.bf16.mxu1 %v1196_v0 }
  0x75   :  { %506 = vmatpush1.bf16.msra.mxu0 %v1198_v1  ;;  %549 = vmatpush1.bf16.msra.mxu1 %v1199_v2 }
  0x76   :  { %1052 = vmatprep.subr.bf16.mxu0 %v1200_v5  ;;  %1074 = vmatprep.subr.bf16.mxu1 %v1201_v6 }
  0x78   :  { %508 = vmatmul.mubr.bf16.vlgmr.msra.gmra.mrb[0].mxu0 %v67_v8  ;;  %551 = vmatmul.mubr.bf16.vlgmr.msra.gmra.mrb[0].mxu1 %v67_v8 }
  0x79   :  { %1053 = vmatpush3.bf16.msra.mxu0 %v1202_v7  ;;  %1075 = vmatpush3.bf16.msra.mxu1 %v1203_v9 }
  0x7a   :  { %1054 = vmatprep.subr.bf16.mxu0 %v1204_v10  ;;  %1076 = vmatprep.subr.bf16.mxu1 %v1205_v11 }
  0x7d   :  { %1055 = vmatpush3.bf16.msra.mxu0 %v1206_v12  ;;  %1077 = vmatpush3.bf16.msra.mxu1 %v1207_v13 }
  0x7e   :  { %1056 = vmatprep.subr.bf16.mxu0 %v1208_v14  ;;  %1078 = vmatprep.subr.bf16.mxu1 %v1209_v15  ;;  %v1010_v15 = vld [vmem:[%s1435_s4] ss:$0 sm:$0xff]  ;;  %s1298_s4 = scalar_lea.vmem %s934_s9, 128 }
  0x7f   :  { %p1299_p10 = scmp.ne.s32.totalorder %s934_s9, %s1298_s4  ;;  %p1304_p12 = scmp.lt.s32.totalorder %s1298_s4, %s1298_s4 }
  0x81   :  { %1057 = vmatpush3.bf16.msra.mxu0 %v1210_v16  ;;  %1079 = vmatpush3.bf16.msra.mxu1 %v1211_v17  ;;  %p1305_p13 = por %p1304_p12, %p1303_p11 }
  0x82   :  { %1058 = vmatprep.subr.bf16.mxu0 %v1212_v18  ;;  %1080 = vmatprep.subr.bf16.mxu1 %v1213_v19 }
  0x83   :  { %p1306_p0 = pnand %p1305_p13, %p1299_p10 }
  0x85   :  { %1059 = vmatpush3.bf16.msra.mxu0 %v1214_v20  ;;  %1081 = vmatpush3.bf16.msra.mxu1 %v1215_v21 }
  0x86   :  { %1060 = vmatprep.subr.bf16.mxu0 %v1216_v22  ;;  %1082 = vmatprep.subr.bf16.mxu1 %v1217_v23 }
  0x89   :  { %1061 = vmatpush3.bf16.msra.mxu0 %v1218_v24  ;;  %1083 = vmatpush3.bf16.msra.mxu1 %v1219_v25 }
  0x8a   :  { %1062 = vmatprep.subr.bf16.mxu0 %v1220_v26  ;;  %1084 = vmatprep.subr.bf16.mxu1 %v1221_v27 }
  0x8d   :  { %1063 = vmatpush3.bf16.msra.mxu0 %v1222_v28  ;;  %1085 = vmatpush3.bf16.msra.mxu1 %v1223_v29 }
  0x8e   :  { %1064 = vmatprep.subr.bf16.mxu0 %v1224_v30  ;;  %1086 = vmatprep.subr.bf16.mxu1 %v1225_v31 }
  0x91   :  { %1065 = vmatpush3.bf16.msra.mxu0 %v1226_v32  ;;  %1087 = vmatpush3.bf16.msra.mxu1 %v1227_v33 }
  0x92   :  { %1066 = vmatprep.subr.bf16.mxu0 %v1228_v34  ;;  %1088 = vmatprep.subr.bf16.mxu1 %v1229_v35 }
  0x95   :  { %1067 = vmatpush3.bf16.msra.mxu0 %v1230_v36  ;;  %1089 = vmatpush3.bf16.msra.mxu1 %v1231_v37 }
 0x14b   :  { %v509_v49 = vpop.f32.mrb[0].mxu0  ;;  %v552_v50 = vpop.f32.mrb[0].mxu1 }
 0x14c   :  { %v510_v51 = vadd.f32 %v509_v49, %v138_v45  ;;  %v553_v52 = vadd.f32 %v552_v50, %v146_v46  ;;  %v511_v53 = vpop.f32.mrb[1].mxu0  ;;  %v554_v54 = vpop.f32.mrb[1].mxu1 }
 0x14d   :  { %v512_v55 = vadd.f32 %v511_v53, %v142_v47  ;;  %v555_v56 = vadd.f32 %v554_v54, %v150_v48  ;;  %v513_v57 = vpop.f32.mrb[2].mxu0  ;;  %v556_v58 = vpop.f32.mrb[2].mxu1 }
 0x14e   :  { %v563_v59 = vmax.f32 %v553_v52, 0.0  ;;  %v514_v60 = vadd.f32 %v513_v57, %v138_v45  ;;  %v557_v61 = vadd.f32 %v556_v58, %v146_v46  ;;  %v515_v62 = vpop.f32.mrb[3].mxu0  ;;  %v558_v63 = vpop.f32.mrb[3].mxu1  ;;  %v561_v3 = vmax.f32 %v510_v51, 0.0 }
 0x14f   :  { %v564_v0 = vmax.f32 %v555_v56, 0.0  ;;  %v516_v1 = vadd.f32 %v515_v62, %v142_v47  ;;  %v559_v2 = vadd.f32 %v558_v63, %v150_v48  ;;  %v562_v6 = vmax.f32 %v512_v55, 0.0 }
 0x150   :  { %v565_v4 = vmax.f32 %v514_v60, 0.0  ;;  %v567_v5 = vmax.f32 %v557_v61, 0.0 }
 0x151   :  { %v566_v7 = vmax.f32 %v516_v1, 0.0  ;;  %v568_v8 = vmax.f32 %v559_v2, 0.0 }
 0x152   :  { %v569_v9 = vpack.c.bf16 %v565_v4, %v561_v3  ;;  %v571_v10 = vpack.c.bf16 %v567_v5, %v563_v59 }
 0x153   :  { %v570_v11 = vpack.c.bf16 %v566_v7, %v562_v6  ;;  %v572_v12 = vpack.c.bf16 %v568_v8, %v564_v0 }
 0x155   :  { %868 = vmatprep.mubr.bf16.mxu0 %v570_v11  ;;  %909 = vmatprep.mubr.bf16.mxu1 %v572_v12 }
 0x156   :  { %869 = vmatmul.mubr.bf16.vlgmr.msra.gmra.mrb[4].mxu0 %v569_v9  ;;  %910 = vmatmul.mubr.bf16.vlgmr.msra.gmra.mrb[4].mxu1 %v571_v10 }
 0x229   :  { %v1068_v13 = vpop.f32.mrb[4].mxu0  ;;  %v1090_v14 = vpop.f32.mrb[4].mxu1 }
 0x22a   :  { %v1069_v16 = vpop.f32.mrb[5].mxu0  ;;  %v1091_v17 = vpop.f32.mrb[5].mxu1 }
 0x22b   :  { %v1070_v18 = vadd.f32 %v1069_v16, %v1068_v13  ;;  %v1092_v19 = vadd.f32 %v1091_v17, %v1090_v14  ;;  %v1071_v20 = vpop.f32.mrb[6].mxu0  ;;  %v1093_v21 = vpop.f32.mrb[6].mxu1 }
 0x22c   :  { %v1072_v22 = vpop.f32.mrb[7].mxu0  ;;  %v1094_v23 = vpop.f32.mrb[7].mxu1 }
 0x22d   :  { %v871_v24 = vadd.f32 %v1070_v18, %v1010_v15  ;;  %v1073_v25 = vadd.f32 %v1072_v22, %v1071_v20  ;;  %v1095_v26 = vadd.f32 %v1094_v23, %v1093_v21 }
 0x22f   :  { %v912_v27 = vadd.f32 %v1092_v19, %v871_v24  ;;  %v874_v28 = vadd.f32 %v1073_v25, %v1010_v15 }
 0x231   :  { %v915_v29 = vadd.f32 %v1095_v26, %v874_v28 }
 0x233   :  { %v1050_v30 = vpack.c.bf16 %v915_v29, %v912_v27 }
 0x235   :  { %1051 = vst [vmem:[#allocation8] sm:$0xff] %v1050_v30  }
 0x236   :  { %1309 = shalt.err (!%p1306_p0)
}
 0x237   :  { %s1310_s12 = scalar_lea.hbm %s1436_s5, 128 }
 0x238   :  { %p1311_p1 = scmp.ne.s32.totalorder %s1436_s5, %s1310_s12  ;;  %p1314_p2 = scmp.lt.u32.totalorder %s1310_s12, %s1436_s5 }
 0x23a   :  { %p1316_p3 = pnand %p1314_p2, %p1311_p1 }
 0x23c   :  { %1319 = shalt.err (!%p1316_p3)
}
 0x23d   :  { %939 = dma.vmem_to_hbm [thread:$0]  %s934_s9, 128, %s1436_s5, [#allocation4], %s1331_s0, %s1331_s0, %s1332_s21  }
 0x23e   :  { %1324 = dma.done.wait [#allocation4], 128  }
 0x23f   :  { %1325 = vsyncadd [#allocation4], 4294967168 }
 0x240   :  { %943 = vsyncpa [#allocation3], 1 }
 0x241   :  { %944 = vsyncpa [#allocation6], 1 }
 0x242   :  { %945 = vsyncpa [#allocation4], 1 }

</bundles_post_ra>
